<compile_context>
chip_gen: v6e
topology: v6e:2x2x1
jax: 0.10.0
libtpu: 0.0.40
codegen_flags: <defaults>
</compile_context>

<pallas_src>
import jax
import jax.numpy as jnp
from jax.experimental import pallas as pl
from jax.experimental.pallas import tpu as pltpu


def attention_kernel(x_ref, w_ref, b_ref, ctx_ref, attw_ref):
    # x_ref:    (BB, T, H)  VMEM  block of batch rows (native dtype, no f32 copy)
    # w_ref:    (1, H)      VMEM  lane-dense attention weight row
    # b_ref:    (1,)        SMEM  scalar bias
    # ctx_ref:  (BB, H)     VMEM  context vectors (input dtype)
    # attw_ref: (BB, T)     VMEM  lane-dense attention weights (float32)
    x = x_ref[...]                                           # (BB, T, H)
    w = w_ref[...].astype(jnp.float32)                       # (1, H)
    b = b_ref[0]                                             # scalar (SMEM)

    # Linear(hidden_dim, 1): per-row reduce over H (lane axis) -> (BB, T) f32.
    scores = jnp.sum(x * w[None, :, :], axis=-1) + b         # (BB, T)

    # Numerically stable softmax over time (lane axis of this layout).
    m = jnp.max(scores, axis=-1, keepdims=True)              # (BB, 1)
    e = jnp.exp(scores - m)                                  # (BB, T)
    denom = jnp.sum(e, axis=-1, keepdims=True)               # (BB, 1)
    inv = 1.0 / denom                                        # BB exact reciprocals
    att = e * inv                                            # (BB, T) f32

    # context = sum_t att[b, t] * x[b, t, :]  -- VPU multiply + sublane reduce.
    ctx = jnp.sum(att[:, :, None] * x, axis=1)               # (BB, H) f32

    ctx_ref[...] = ctx.astype(ctx_ref.dtype)
    attw_ref[...] = att.astype(attw_ref.dtype)


def _round_up(v, m):
    return ((v + m - 1) // m) * m


def _vmem_capacity_bytes(default=64 * 1024 * 1024):
    """Physical VMEM capacity; falls back to the v7x floor (64 MiB)."""
    try:
        info = pltpu.get_tpu_info()
        cap = getattr(info, "vmem_capacity_bytes", None)
        if cap:
            return int(cap)
    except Exception:
        pass
    return default


def attention_layer(lstm_output, weight, bias):
    """Pallas implementation of AttentionLayer.forward.

    Args:
      lstm_output: (B, T, H) float32 / bfloat16
      weight:      (1, H)    attention Linear(hidden_dim, 1) weight
      bias:        (1,)      attention Linear(hidden_dim, 1) bias
    Returns:
      context_vector:    (B, H)   in lstm_output.dtype
      attention_weights: (B, T, 1) float32
    """
    B, T, H = lstm_output.shape
    out_dtype = lstm_output.dtype
    in_itemsize = jnp.dtype(out_dtype).itemsize

    w_row = weight.reshape(1, H)
    b_sm = bias.reshape(1).astype(jnp.float32)

    # ---- VMEM-footprint-aware batch-block sizing -------------------------
    vmem_cap = _vmem_capacity_bytes()
    # 96 MiB limit on 128-MiB chips (v5e/v6e), 48 MiB on 64-MiB v7x.
    vmem_limit = min(int(vmem_cap) * 3 // 4, 96 * 1024 * 1024)
    budget = vmem_limit * 3 // 5          # headroom for compiler temporaries

    sub_in = max(8, 32 // in_itemsize)    # sublane multiple for input dtype
    Hp = _round_up(H, 128)                # H padded to 128 lanes
    Tp_sub = _round_up(T, sub_in)         # T as sublane axis of the input block
    Tp_lane = _round_up(T, 128)           # T as lane axis of scores / attw

    # Per-batch-row VMEM cost: double-buffered input + outputs + f32 temps.
    per_row = (
        2 * Tp_sub * Hp * in_itemsize                 # input block  (x2 buffers)
        + 2 * _round_up(T, 8) * Hp * 4                # f32 full-block temporaries
        + 2 * Hp * in_itemsize                        # ctx output   (x2 buffers)
        + 2 * Tp_lane * 4                             # attw output  (x2 buffers, f32)
        + 4 * Tp_lane * 4                             # scores/e/att row temps
        + Hp * 4                                      # ctx f32 temp
    )
    bb_cap = max(8, (int(budget) // int(per_row)) // 8 * 8)

    # Keep >= ~8 grid steps (when B allows) so DMA of block i+1 overlaps
    # compute of block i and both v7x TensorCores get work.
    min_steps = 8
    bb_steps = max(8, _round_up(pl.cdiv(B, min_steps), 8))
    BB = min(bb_cap, bb_steps)
    if B <= BB:
        BB = B                           # block dims == full array dims
    grid = (pl.cdiv(B, BB),)             # ragged last block masked by Pallas

    cost = pl.CostEstimate(
        flops=int(4 * B * T * H + 6 * B * T),
        transcendentals=int(B * T),
        bytes_accessed=int(B * T * H * in_itemsize      # read lstm_output
                           + B * H * in_itemsize        # write context
                           + B * T * 4                  # write attn weights (f32)
                           + H * 4 + 4),                # weight + bias
    )

    grid_spec = pltpu.PrefetchScalarGridSpec(
        num_scalar_prefetch=0,
        grid=grid,
        in_specs=[
            pl.BlockSpec((BB, T, H), lambda b: (b, 0, 0)),          # lstm block
            pl.BlockSpec((1, H), lambda b: (0, 0)),                 # weight row
            pl.BlockSpec(memory_space=pltpu.MemorySpace.SMEM),      # bias scalar
        ],
        out_specs=[
            pl.BlockSpec((BB, H), lambda b: (b, 0)),                # context
            pl.BlockSpec((BB, T), lambda b: (b, 0)),                # attn (lane-dense)
        ],
    )

    ctx, attw = pl.pallas_call(
        attention_kernel,
        out_shape=(
            jax.ShapeDtypeStruct((B, H), out_dtype),
            jax.ShapeDtypeStruct((B, T), jnp.float32),
        ),
        grid_spec=grid_spec,
        compiler_params=pltpu.CompilerParams(
            dimension_semantics=("parallel",),
            vmem_limit_bytes=int(vmem_limit),
        ),
        cost_estimate=cost,
    )(lstm_output, w_row, b_sm)

    return ctx, attw.reshape(B, T, 1)    # restore PyTorch's (B, T, 1) shape


def attention_layer_ref(lstm_output, weight, bias):
    """Pure-JAX reference identical to the PyTorch forward."""
    scores = jnp.einsum("bth,oh->bto", lstm_output, weight) + bias  # (B, T, 1)
    attw = jax.nn.softmax(scores, axis=1)
    ctx = jnp.sum(attw * lstm_output, axis=1)
    return ctx, attw


if __name__ == "__main__":
    key = jax.random.PRNGKey(0)
    kx, kw, kb, kx2 = jax.random.split(key, 4)

    B, T, H = 2, 8, 32
    lstm_output = jax.random.normal(kx, (B, T, H), dtype=jnp.float32)
    # nn.Linear(hidden_dim, 1) default init: U(-1/sqrt(H), 1/sqrt(H)).
    bound = 1.0 / jnp.sqrt(jnp.float32(H))
    weight = jax.random.uniform(kw, (1, H), jnp.float32, -bound, bound)
    bias = jax.random.uniform(kb, (1,), jnp.float32, -bound, bound)

    ctx, attw = attention_layer(lstm_output, weight, bias)
    jax.block_until_ready((ctx, attw))

    ctx_ref, attw_ref = attention_layer_ref(lstm_output, weight, bias)
    assert ctx.shape == (B, H) and attw.shape == (B, T, 1)
    assert jnp.allclose(ctx, ctx_ref, atol=1e-5, rtol=1e-5)
    assert jnp.allclose(attw, attw_ref, atol=1e-5, rtol=1e-5)

    # Second shape exercising the multi-block grid + ragged last batch block
    # (B not a multiple of the 8-row block) without any wrapper-side padding.
    B2 = 20
    lstm_output2 = jax.random.normal(kx2, (B2, T, H), dtype=jnp.float32)
    ctx2, attw2 = attention_layer(lstm_output2, weight, bias)
    jax.block_until_ready((ctx2, attw2))
    ctx2_ref, attw2_ref = attention_layer_ref(lstm_output2, weight, bias)
    assert ctx2.shape == (B2, H) and attw2.shape == (B2, T, 1)
    assert jnp.allclose(ctx2, ctx2_ref, atol=1e-5, rtol=1e-5)
    assert jnp.allclose(attw2, attw2_ref, atol=1e-5, rtol=1e-5)

    print("KERNEL_OK")
</pallas_src>

<mosaic_0001>
module attributes {stable_mosaic.version = 11 : i64} {
  func.func @attention_kernel(%arg0: i32, %arg1: memref<2x8x32xf32, #tpu.memory_space<vmem>>, %arg2: memref<1x32xf32, #tpu.memory_space<vmem>>, %arg3: memref<1xf32, #tpu.memory_space<smem>>, %arg4: memref<2x32xf32, #tpu.memory_space<vmem>>, %arg5: memref<2x8xf32, #tpu.memory_space<vmem>>) attributes {dimension_semantics = [#tpu.dimension_semantics<parallel>], iteration_bounds = array<i64: 1>, scalar_prefetch = 0 : i64, scratch_operands = 0 : i64, tpu.core_type = #tpu.core_type<tc>, window_params = [{transform_indices = @transform_0, window_bounds = array<i64: 2, 8, 32>}, {pipeline_mode = #tpu.pipeline_mode<synchronous>, transform_indices = @transform_1, window_bounds = array<i64: 1, 32>}, {transform_indices = @transform_2, window_bounds = array<i64: 1>}, {transform_indices = @transform_3, window_bounds = array<i64: 2, 32>}, {transform_indices = @transform_4, window_bounds = array<i64: 2, 8>}]} {
    %c0 = arith.constant 0 : index
    %c0_0 = arith.constant 0 : index
    %c0_1 = arith.constant 0 : index
    %0 = vector.load %arg1[%c0, %c0_0, %c0_1] : memref<2x8x32xf32, #tpu.memory_space<vmem>>, vector<2x8x32xf32>
    %c0_2 = arith.constant 0 : index
    %c0_3 = arith.constant 0 : index
    %1 = vector.load %arg2[%c0_2, %c0_3] : memref<1x32xf32, #tpu.memory_space<vmem>>, vector<1x32xf32>
    %c0_4 = arith.constant 0 : index
    %2 = memref.load %arg3[%c0_4] : memref<1xf32, #tpu.memory_space<smem>>
    %3 = vector.shape_cast %1 : vector<1x32xf32> to vector<1x1x32xf32>
    %4 = vector.broadcast %3 : vector<1x1x32xf32> to vector<2x8x32xf32>
    %5 = arith.mulf %0, %4 : vector<2x8x32xf32>
    %cst = arith.constant dense<0.000000e+00> : vector<2x8xf32>
    %6 = vector.multi_reduction <add>, %5, %cst [2] : vector<2x8x32xf32> to vector<2x8xf32>
    %7 = vector.broadcast %2 : f32 to vector<2x8xf32>
    %8 = arith.addf %6, %7 : vector<2x8xf32>
    %cst_5 = arith.constant dense<0xFF800000> : vector<2xf32>
    %9 = vector.multi_reduction <maximumf>, %8, %cst_5 [1] : vector<2x8xf32> to vector<2xf32>
    %10 = vector.shape_cast %9 : vector<2xf32> to vector<2x1xf32>
    %11 = vector.broadcast %10 : vector<2x1xf32> to vector<2x8xf32>
    %12 = arith.subf %8, %11 : vector<2x8xf32>
    %13 = math.exp %12 : vector<2x8xf32>
    %cst_6 = arith.constant dense<0.000000e+00> : vector<2xf32>
    %14 = vector.multi_reduction <add>, %13, %cst_6 [1] : vector<2x8xf32> to vector<2xf32>
    %15 = vector.shape_cast %14 : vector<2xf32> to vector<2x1xf32>
    %cst_7 = arith.constant 1.000000e+00 : f32
    %16 = vector.broadcast %cst_7 : f32 to vector<2x1xf32>
    %17 = arith.divf %16, %15 : vector<2x1xf32>
    %18 = vector.broadcast %17 : vector<2x1xf32> to vector<2x8xf32>
    %19 = arith.mulf %13, %18 : vector<2x8xf32>
    %20 = vector.shape_cast %19 : vector<2x8xf32> to vector<2x8x1xf32>
    %21 = vector.broadcast %20 : vector<2x8x1xf32> to vector<2x8x32xf32>
    %22 = arith.mulf %21, %0 : vector<2x8x32xf32>
    %cst_8 = arith.constant dense<0.000000e+00> : vector<2x32xf32>
    %23 = vector.multi_reduction <add>, %22, %cst_8 [1] : vector<2x8x32xf32> to vector<2x32xf32>
    %c0_9 = arith.constant 0 : index
    %c0_10 = arith.constant 0 : index
    %24 = vector.load %arg4[%c0_9, %c0_10] : memref<2x32xf32, #tpu.memory_space<vmem>>, vector<2x32xf32>
    tpu.vector_store %arg4[%c0_9, %c0_10], %23 {strides = array<i32>} : memref<2x32xf32, #tpu.memory_space<vmem>>, vector<2x32xf32>,
    %c0_11 = arith.constant 0 : index
    %c0_12 = arith.constant 0 : index
    %25 = vector.load %arg5[%c0_11, %c0_12] : memref<2x8xf32, #tpu.memory_space<vmem>>, vector<2x8xf32>
    tpu.vector_store %arg5[%c0_11, %c0_12], %19 {strides = array<i32>} : memref<2x8xf32, #tpu.memory_space<vmem>>, vector<2x8xf32>,
    return
  }
  func.func @transform_0(%arg0: i32) -> (i32, i32, i32) {
    %c0_i32 = arith.constant 0 : i32
    %c0_i32_0 = arith.constant 0 : i32
    %c0_i32_1 = arith.constant 0 : i32
    return %arg0, %c0_i32, %c0_i32_0 : i32, i32, i32
  }
  func.func @transform_1(%arg0: i32) -> (i32, i32) {
    %c0_i32 = arith.constant 0 : i32
    %c0_i32_0 = arith.constant 0 : i32
    %c0_i32_1 = arith.constant 0 : i32
    return %c0_i32, %c0_i32_0 : i32, i32
  }
  func.func @transform_2(%arg0: i32) -> i32 {
    %c0_i32 = arith.constant 0 : i32
    %c0_i32_0 = arith.constant 0 : i32
    return %c0_i32 : i32
  }
  func.func @transform_3(%arg0: i32) -> (i32, i32) {
    %c0_i32 = arith.constant 0 : i32
    %c0_i32_0 = arith.constant 0 : i32
    return %arg0, %c0_i32 : i32, i32
  }
  func.func @transform_4(%arg0: i32) -> (i32, i32) {
    %c0_i32 = arith.constant 0 : i32
    %c0_i32_0 = arith.constant 0 : i32
    return %arg0, %c0_i32 : i32, i32
  }
}

</mosaic_0001>

<bundles_post_ra>
// kernel: tpu_custom_call.1
= control target key start
LH: loop header
LB: loop body
LE: loop exit
PB: predicated region body
PF: predicated region fallthrough
CT: control target
= control target key end

     0   :  { %11 = vsyncpa [#allocation4], 0  ;;  %s341_s0 = inlined_call_operand.hbm [shape: f32[2,8,32], index: 0, kind: input, shape index: {}]   ;;  %s342_s1 = inlined_call_operand.vmem [shape: f32[1,32], index: 1, kind: input, shape index: {}]   ;;  %s343_s2 = inlined_call_operand.<no memory space> [shape: f32[1], index: 2, kind: input, shape index: {}]   ;;  %s344_s3 = inlined_call_operand.hbm [shape: f32[2,32], index: 3, kind: output, shape index: {0}]   ;;  %s345_s4 = inlined_call_operand.hbm [shape: f32[2,8], index: 4, kind: output, shape index: {1}]  }
   0x1   :  { %12 = vsyncpa [#allocation5], 0 }
   0x2   :  { %13 = vsyncpa [#allocation8], 0  ;;  %s280_s15 = smov [#allocation3]  }
   0x3   :  { %s19_s16 = sshll.u32 %s280_s15, 4  ;;  %s20_s16 = int_to_ptr.vmem [resolvable:$true] %s19_s16 }
   0x4   :  { %s222_s17 = scalar_lea.vmem %s20_s16, 256  ;;  %p227_p1 = scmp.lt.s32.totalorder %s20_s16, %s20_s16 }
   0x5   :  { %p223_p0 = scmp.ne.s32.totalorder %s20_s16, %s222_s17  ;;  %p228_p2 = scmp.lt.s32.totalorder %s222_s17, %s222_s17 }
   0x7   :  { %p229_p3 = por %p228_p2, %p227_p1 }
   0x9   :  { %p230_p4 = pnand %p229_p3, %p223_p0 }
   0xb   :  { %233 = shalt.err (!%p230_p4)
}
   0xc   :  { %s281_s18 = smov 128   ;;  %s282_s19 = smov 8  }
   0xd   :  { %25 = dma.hbm_to_vmem [thread:$0]  %s341_s0, 256, %s20_s16, [#allocation4], %s281_s18, %s281_s18, %s282_s19  }
   0xe   :  { %274 = dma.done.wait [#allocation4], 256  }
   0xf   :  { %275 = vsyncadd [#allocation4], 4294967040  ;;  %v33_v0 = vld [vmem:[#allocation3] sm:$0xff]  ;;  %vm45_vm0 = vcmask 261120   ;;  %v317_v2 = vld [vmem:[#allocation3 + $0x8] sm:$0xff]  ;;  %v57_v7 = vlaneseq  ;;  %v52_v10 = vstv %s343_s2  ;;  %vm67_vm1 = vcmask 1041409  }
  0x10   :  { %v199_v1 = vld [vmem:[%s342_s1] ss:$0 sm:$0xff]  ;;  %vm70_vm2 = vcmask 58368   ;;  %v283_v20 = vmov 0   ;;  %s284_s1 = smov [#allocation7]  }
  0x11   :  { %v43_v3 = vmul.f32 %v199_v1, %v33_v0  ;;  %v44_v4 = vmul.f32 %v199_v1, %v317_v2  ;;  %v58_v8 = vand.u32 127, %v57_v7  ;;  %v60_v9 = vshrl.u32 %v57_v7, 7  ;;  %207 = vset.pattern.permute.xlu0 %v283_v20  ;;  %206 = vset.pattern.permute.xlu1 %v283_v20  ;;  %s186_s2 = sshll.u32 %s284_s1, 4  ;;  %s187_s2 = int_to_ptr.vmem [resolvable:$true] %s186_s2 }
  0x12   :  { %s234_s25 = scalar_lea.vmem %s187_s2, 32  ;;  %p239_p6 = scmp.lt.s32.totalorder %s187_s2, %s187_s2 }
  0x13   :  { %v46_v5 = vsel %vm45_vm0, %v43_v3, 0.0  ;;  %v49_v6 = vsel %vm45_vm0, %v44_v4, 0.0  ;;  %v61_v12 = vsub.s32 %v58_v8, %v60_v9  ;;  %v77_v21 = vsub.s32 0, %v60_v9  ;;  %p235_p5 = scmp.ne.s32.totalorder %s187_s2, %s234_s25  ;;  %p240_p7 = scmp.lt.s32.totalorder %s234_s25, %s234_s25 }
  0x14   :  { %47 = vadd.xlane.f32.xlu0 %v46_v5  ;;  %v81_v22 = vsub.s32 1, %v60_v9 }
  0x15   :  { %p241_p8 = por %p240_p7, %p239_p6 }
  0x17   :  { %p242_p9 = pnand %p241_p8, %p235_p5 }
  0x18   :  { %50 = vadd.xlane.f32.xlu0 %v49_v6 }
  0x9d   :  { %v48_v11 = vpop.xlane.xlu0 %47 }
  0x9e   :  { %v53_v13 = vadd.f32 %v52_v10, %v48_v11 }
  0xa0   :  { %v62_v16 = vrot.slane %v53_v13, %v61_v12 }
  0xa1   :  { %v51_v14 = vpop.xlane.xlu0 %50 }
  0xa2   :  { %v54_v15 = vadd.f32 %v52_v10, %v51_v14 }
  0xa4   :  { %v66_v17 = vrot.slane %v54_v15, %v61_v12 }
  0xa6   :  { %v68_v18 = vsel %vm67_vm1, %v66_v17, %v62_v16 }
  0xa7   :  { %v71_v19 = vsel %vm70_vm2, %v68_v18, -inf }
  0xa8   :  { %72 = vmax.xlane.f32.xlu1 %v71_v19 }
 0x131   :  { %v73_v23 = vpop.xlane.xlu1 %72 }
 0x132   :  { %v78_v24 = vrot.slane %v73_v23, %v77_v21  ;;  %v82_v25 = vrot.slane %v73_v23, %v81_v22 }
 0x134   :  { %v85_v26 = vsub.f32 %v53_v13, %v78_v24  ;;  %v86_v27 = vsub.f32 %v54_v15, %v82_v25 }
 0x136   :  { %v87_v28 = vmul.f32 1.442695, %v85_v26  ;;  %v89_v29 = vmul.f32 1.442695, %v86_v27 }
 0x138   :  { %208 = vpow2.f32 %v87_v28 }
 0x139   :  { %210 = vpow2.f32 %v89_v29 }
 0x145   :  { %v209_v30 = vpop.eup %208 }
 0x146   :  { %v211_v31 = vpop.eup %210  ;;  %94 = vperm.xlu1 %206, %v209_v30  }
 0x147   :  { %97 = vperm.xlu0 %207, %v211_v31  }
 0x1c1   :  { %v95_v32 = vpop.permute.xlu1 %94 }
 0x1c2   :  { %v98_v33 = vpop.permute.xlu0 %97  ;;  %v102_v34 = vrot.slane %v95_v32, %v61_v12 }
 0x1c3   :  { %v106_v35 = vrot.slane %v98_v33, %v61_v12 }
 0x1c5   :  { %v107_v36 = vsel %vm67_vm1, %v106_v35, %v102_v34 }
 0x1c6   :  { %v109_v37 = vsel %vm70_vm2, %v107_v36, 0.0 }
 0x1c7   :  { %110 = vadd.xlane.f32.xlu1 %v109_v37 }
 0x250   :  { %v111_v38 = vpop.xlane.xlu1 %110 }
 0x251   :  { %212 = vrcp.f32 %v111_v38 }
 0x25e   :  { %v213_v39 = vpop.eup %212 }
 0x25f   :  { %v118_v40 = vrot.slane %v213_v39, %v77_v21  ;;  %v122_v42 = vrot.slane %v213_v39, %v81_v22 }
 0x261   :  { %v125_v41 = vmul.f32 %v209_v30, %v118_v40  ;;  %v126_v43 = vmul.f32 %v211_v31, %v122_v42 }
 0x263   :  { %129 = vperm.xlu0 %207, %v125_v41  }
 0x267   :  { %134 = vperm.xlu0 %207, %v126_v43  }
 0x2de   :  { %v130_v44 = vpop.permute.xlu0 %129 }
 0x2df   :  { %v137_v45 = vmul.f32 %v130_v44, %v33_v0  ;;  %v162_v49 = vrot.slane %v130_v44, %v61_v12 }
 0x2e1   :  { %v139_v46 = vsel %vm45_vm0, %v137_v45, 0.0 }
 0x2e2   :  { %v140_v47 = vrot.slane %v139_v46, 4  ;;  %v135_v48 = vpop.permute.xlu0 %134 }
 0x2e3   :  { %v138_v50 = vmul.f32 %v135_v48, %v317_v2  ;;  %v166_v51 = vrot.slane %v135_v48, %v61_v12 }
 0x2e4   :  { %v141_v52 = vadd.f32 %v140_v47, %v139_v46 }
 0x2e5   :  { %v146_v53 = vsel %vm45_vm0, %v138_v50, 0.0  ;;  %v167_v54 = vsel %vm67_vm1, %v166_v51, %v162_v49 }
 0x2e6   :  { %v142_v55 = vrot.slane %v141_v52, 2  ;;  %v147_v56 = vrot.slane %v146_v53, 4  ;;  %169 = vst.msk [vmem:[#allocation7] sm:$0x3] %vm70_vm2, %v167_v54 }
 0x2e7   :  { %245 = shalt.err (!%p242_p9)
}
 0x2e8   :  { %189 = dma.vmem_to_hbm [thread:$0]  %s187_s2, 32, %s345_s4, [#allocation8]   ;;  %v143_v57 = vadd.f32 %v142_v55, %v141_v52  ;;  %v148_v58 = vadd.f32 %v147_v56, %v146_v53  ;;  %vm157_vm3 = vcmask 254976  }
 0x2e9   :  { %s285_s28 = smov [#allocation6]  }
 0x2ea   :  { %v149_v59 = vrot.slane %v148_v58, 2  ;;  %v144_v60 = vrot.slane %v143_v57, 1  ;;  %s176_s29 = sshll.u32 %s285_s28, 4  ;;  %s177_s29 = int_to_ptr.vmem [resolvable:$true] %s176_s29 }
 0x2eb   :  { %s254_s30 = scalar_lea.vmem %s177_s29, 32  ;;  %p259_p11 = scmp.lt.s32.totalorder %s177_s29, %s177_s29 }
 0x2ec   :  { %v150_v61 = vadd.f32 %v149_v59, %v148_v58  ;;  %v145_v0 = vadd.f32 %v144_v60, %v143_v57  ;;  %p255_p10 = scmp.ne.s32.totalorder %s177_s29, %s254_s30  ;;  %p260_p12 = scmp.lt.s32.totalorder %s254_s30, %s254_s30 }
 0x2ee   :  { %v151_v62 = vrot.slane %v150_v61, 1  ;;  %p261_p13 = por %p260_p12, %p259_p11 }
 0x2f0   :  { %v152_v63 = vadd.f32 %v151_v62, %v150_v61  ;;  %p262_p0 = pnand %p261_p13, %p255_p10 }
 0x2f2   :  { %v155_v1 = vsel %vm67_vm1, %v152_v63, %v145_v0 }
 0x2f3   :  { %158 = vst.msk [vmem:[#allocation6] sm:$0x3] %vm157_vm3, %v155_v1 }
 0x2f4   :  { %265 = shalt.err (!%p262_p0)
}
 0x2f5   :  { %179 = dma.vmem_to_hbm [thread:$0]  %s177_s29, 32, %s344_s3, [#allocation5]  }
 0x2f6   :  { %276 = dma.done.wait [#allocation5], 32  }
 0x2f7   :  { %277 = vsyncadd [#allocation5], 4294967264 }
 0x2f8   :  { %278 = dma.done.wait [#allocation8], 32  }
 0x2f9   :  { %279 = vsyncadd [#allocation8], 4294967264 }
 0x2fa   :  { %196 = vsyncpa [#allocation4], 1 }
 0x2fb   :  { %197 = vsyncpa [#allocation5], 1 }
 0x2fc   :  { %198 = vsyncpa [#allocation8], 1 }

</bundles_post_ra>
